<compile_context>
chip_gen: v7x
topology: tpu7x:2x2x1
jax: 0.10.0
libtpu: 0.0.40
codegen_flags: <defaults>
</compile_context>

<pallas_src>
import numpy as np
import jax
import jax.numpy as jnp
from jax import lax
from jax.experimental import pallas as pl
from jax.experimental.pallas import tpu as pltpu

# ----------------------------- config ---------------------------------------
LOCAL_OBS_DIM = 24          # config.local_obs_dim
ACTION_DIM = 4              # config.action_dim
ACT_PAD = 8                 # actions zero-padded to 8 lanes (sublane-aligned W1a slice)
TASK_EMB_DIM = 8            # config.task_emb_dim
N_TASKS = 4
HIDDEN = 64
INPUT_DIM = LOCAL_OBS_DIM + TASK_EMB_DIM            # 32
CRITIC_IN = INPUT_DIM + ACTION_DIM                  # 36
OUT_DIM = ACTION_DIM * 2                            # actor head output (=8)
LN_EPS = 1e-5
TM_MAX = 1024               # rows per grid step

# weight-slab row offsets (all multiples of 16 -> free static slices even in bf16)
R_W1S, R_W2A, R_W2B, R_WH, R_W1A, R_CARE, W_ROWS = 0, 64, 128, 192, 256, 272, 304
V_ROWS = 16


def _round_up(x, m):
    return ((x + m - 1) // m) * m


def _choose_tiling(n_pad, tm_max):
    """Rows/step + grid size.  Keep the grid even (>=2 steps) whenever there are
    >= 16 rows so v7x's two TensorCores both get balanced work; single step only
    for tiny batches (v5e/v6e pay ~0.35us per extra step, negligible)."""
    tm_max = max(8, (tm_max // 8) * 8)
    if n_pad <= 8:
        return n_pad, 1
    g = max(2, -(-n_pad // tm_max))
    if g % 2:
        g += 1
    tm = _round_up(-(-n_pad // g), 8)
    grid = -(-n_pad // tm)
    for _ in range(3):                       # rounding can shrink the grid to odd
        if grid % 2 == 0 or grid == 1:
            break
        g += 2
        tm = _round_up(-(-n_pad // g), 8)
        grid = -(-n_pad // tm)
    return tm, grid


# ----------------------------- kernel ---------------------------------------
def _normalize(x, d):
    """LayerNorm without affine (gamma/beta folded into the next Linear).
    Single-pass stats: E[x] and E[x^2].  All f32 (VPU work stays f32 for v5e)."""
    s = jnp.sum(x, axis=-1, keepdims=True)
    q = jnp.sum(x * x, axis=-1, keepdims=True)
    mu = s * (1.0 / d)
    var = q * (1.0 / d) - mu * mu
    return (x - mu) * lax.rsqrt(var + LN_EPS)


def gpt_mlp_kernel(s_ref, a_ref, w_ref, v_ref, o_ref):
    # ---- static, sublane-aligned slices of the single bf16 weight slab (free) ----
    w1s  = w_ref[R_W1S:R_W1S + HIDDEN, :]            # (64, 64)  rows 24:64 are zero
    w2a  = w_ref[R_W2A:R_W2A + HIDDEN, :]            # (64, 64)
    w2b  = w_ref[R_W2B:R_W2B + HIDDEN, :]            # (64, 64)
    wh   = w_ref[R_WH:R_WH + HIDDEN, :]              # (64, 64)  cols 8:64 are zero
    w1a  = w_ref[R_W1A:R_W1A + ACT_PAD, :]           # (8, 64)   rows 4:8 are zero
    carw = w_ref[R_CARE:R_CARE + LOCAL_OBS_DIM, :]   # (24, 64)  cols 24:64 are zero

    # ---- small-vector slab (f32) ----
    b1     = v_ref[0:1, :]                 # fc1 bias (+ folded LN0 beta @ W1)
    b2a    = v_ref[1:2, :]                 # fc2[0] bias (+ folded LN1 beta)
    b2b    = v_ref[2:3, :]                 # fc2[1] bias (+ folded LN2a beta)
    bh     = v_ref[3:4, 0:OUT_DIM]         # folded LN2b beta @ W_head
    careb  = v_ref[4:5, :]                 # CARE encoder bias (64-wide, tail zero)
    c_temb = v_ref[5:6, :]                 # task_emb @ W1[temb rows]  (1, 64)
    colsum = v_ref[6:7, :]                 # ones(1,36) @ W1           (1, 64)
    s_t    = v_ref[7:8, 0:1]               # sum(task_emb)             (1, 1)
    q_t    = v_ref[8:9, 0:1]               # sum(task_emb^2)           (1, 1)

    s = s_ref[...]                          # (tm, 24) f32
    a = a_ref[...]                          # (tm, 8)  f32, cols 4:8 zero

    # CARE encoder stand-in (fused): ReLU(Linear(state)); output 64-wide, tail lanes 0
    enc = jnp.maximum(
        jnp.dot(s.astype(jnp.bfloat16), carw,
                preferred_element_type=jnp.float32) + careb, 0.0)

    # feature_norm_critic over the virtual concat [enc | task_emb | act] (D=36),
    # folded algebraically into fc1: only enc/act row-stats are computed here; the
    # constant task-embedding part arrives via s_t / q_t / c_temb / colsum.
    ssum  = jnp.sum(enc, -1, keepdims=True) + jnp.sum(a, -1, keepdims=True) + s_t
    sqsum = (jnp.sum(enc * enc, -1, keepdims=True)
             + jnp.sum(a * a, -1, keepdims=True) + q_t)
    mu = ssum * (1.0 / CRITIC_IN)
    var = sqsum * (1.0 / CRITIC_IN) - mu * mu
    rstd = lax.rsqrt(var + LN_EPS)

    # fc1_critic Linear (LN0 gamma/beta folded into w1/b1 in the wrapper)
    hlin = (jnp.dot(enc.astype(jnp.bfloat16), w1s, preferred_element_type=jnp.float32)
            + jnp.dot(a.astype(jnp.bfloat16), w1a, preferred_element_type=jnp.float32)
            + c_temb)
    h = jnp.maximum(rstd * hlin - (mu * rstd) * colsum + b1, 0.0)

    # fc2[0]: LN1 (affine folded) -> Linear -> ReLU
    h = jnp.maximum(
        jnp.dot(_normalize(h, HIDDEN).astype(jnp.bfloat16), w2a,
                preferred_element_type=jnp.float32) + b2a, 0.0)
    # fc2[1]: LN2a (affine folded) -> Linear -> ReLU
    h = jnp.maximum(
        jnp.dot(_normalize(h, HIDDEN).astype(jnp.bfloat16), w2b,
                preferred_element_type=jnp.float32) + b2b, 0.0)
    # head: LN2b (affine folded) -> Linear(64, 8, no bias); wh lane-padded to 64
    y = jnp.dot(_normalize(h, HIDDEN).astype(jnp.bfloat16), wh,
                preferred_element_type=jnp.float32)
    o_ref[...] = y[:, 0:OUT_DIM] + bh


# ------------------------------ wrapper --------------------------------------
def gpt_mlp_pallas(states, actions, params, task_id=0, tm_max=TM_MAX):
    """states: (N, LOCAL_OBS_DIM) f32, actions: (N, ACTION_DIM) f32 -> (N, OUT_DIM) f32."""
    n = states.shape[0]
    n_pad = _round_up(max(n, 8), 8)          # pad only to a multiple of 8 rows
    if n_pad != n:
        states = jnp.pad(states, ((0, n_pad - n), (0, 0)))
        actions = jnp.pad(actions, ((0, n_pad - n), (0, 0)))
    actions = jnp.pad(actions, ((0, 0), (0, ACT_PAD - ACTION_DIM)))   # 4 -> 8 lanes
    tm, grid = _choose_tiling(n_pad, tm_max)

    # ---- fold each LayerNorm's gamma/beta into the following Linear (tiny, one-off) ----
    p = params
    w1f  = p["w1"] * p["ln0_g"].T                              # diag(g0) @ W1
    b1f  = p["ln0_b"] @ p["w1"] + p["b1"]
    w2af = p["w2a"] * p["ln1_g"].T
    b2af = p["ln1_b"] @ p["w2a"] + p["b2a"]
    w2bf = p["w2b"] * p["ln2a_g"].T
    b2bf = p["ln2a_b"] @ p["w2b"] + p["b2b"]
    whf  = p["w_head"] * p["ln2b_g"].T
    bhf  = p["ln2b_b"] @ p["w_head"]                           # head has no bias

    # constants that remove the task-embedding matmul + its stats from the kernel
    temb    = p["task_emb"][task_id][None, :]                  # (1, 8)
    c_temb  = temb @ w1f[LOCAL_OBS_DIM:INPUT_DIM]              # (1, 64)
    colsum  = jnp.sum(w1f, axis=0, keepdims=True)              # (1, 64) = ones@W1
    s_temb  = jnp.sum(temb).reshape(1, 1)
    q_temb  = jnp.sum(temb * temb).reshape(1, 1)

    def padcols(v, cols=HIDDEN):
        return jnp.pad(v, ((0, 0), (0, cols - v.shape[1])))

    def padrows(v, rows):
        return jnp.pad(v, ((0, rows - v.shape[0]), (0, 0)))

    # single bf16 weight slab; row offsets match R_* constants (all 16-aligned)
    zero8 = jnp.zeros((8, HIDDEN), jnp.float32)
    wslab = jnp.concatenate([
        padrows(w1f[:LOCAL_OBS_DIM], HIDDEN),   # rows   0: 64  (enc is 64-wide)
        w2af,                                   # rows  64:128
        w2bf,                                   # rows 128:192
        padcols(whf),                           # rows 192:256
        padrows(w1f[INPUT_DIM:], ACT_PAD),      # rows 256:264
        zero8,                                  # rows 264:272  spacer
        padcols(p["care_w"]),                   # rows 272:296
        zero8,                                  # rows 296:304  spacer
    ], axis=0).astype(jnp.bfloat16)
    assert wslab.shape == (W_ROWS, HIDDEN)

    # single f32 small-vector slab
    vslab = jnp.concatenate([
        b1f, b2af, b2bf, padcols(bhf), padcols(p["care_b"]), c_temb, colsum,
        padcols(s_temb), padcols(q_temb),
        jnp.zeros((V_ROWS - 9, HIDDEN), jnp.float32),
    ], axis=0)
    assert vslab.shape == (V_ROWS, HIDDEN)

    out = pl.pallas_call(
        gpt_mlp_kernel,
        out_shape=jax.ShapeDtypeStruct((n_pad, OUT_DIM), jnp.float32),
        grid_spec=pltpu.PrefetchScalarGridSpec(
            num_scalar_prefetch=0,
            grid=(grid,),
            in_specs=[
                pl.BlockSpec((tm, LOCAL_OBS_DIM), lambda i: (i, 0)),
                pl.BlockSpec((tm, ACT_PAD), lambda i: (i, 0)),
                pl.BlockSpec(wslab.shape, lambda i: (0, 0)),
                pl.BlockSpec(vslab.shape, lambda i: (0, 0)),
            ],
            out_specs=pl.BlockSpec((tm, OUT_DIM), lambda i: (i, 0)),
        ),
        compiler_params=pltpu.CompilerParams(
            dimension_semantics=("parallel",),
            vmem_limit_bytes=32 * 1024 * 1024),
    )(states, actions, wslab, vslab)
    return out[:n]


def gpt_mlp_forward(states, policy_actions, params, task_id=0):
    """states: (..., LOCAL_OBS_DIM); policy_actions: (..., ACTION_DIM).
    Returns logits of shape (N, 1, OUT_DIM) with N = prod(leading dims)."""
    s2 = states.reshape(-1, LOCAL_OBS_DIM)
    a2 = policy_actions.reshape(-1, ACTION_DIM)
    y = gpt_mlp_pallas(s2, a2, params, task_id)               # whole hot path in Pallas
    return y.reshape(-1, 1, OUT_DIM)


# --------------------------- parameter init ----------------------------------
def _orthogonal(key, out_dim, in_dim, gain):
    """Mimic torch.nn.init.orthogonal_ on a (out, in) weight, returned as (in, out)."""
    rows, cols = out_dim, in_dim
    flat_rows, flat_cols = (rows, cols) if rows >= cols else (cols, rows)
    a = jax.random.normal(key, (flat_rows, flat_cols), dtype=jnp.float32)
    q, r = jnp.linalg.qr(a)
    q = q * jnp.sign(jnp.diag(r))
    if rows < cols:
        q = q.T
    w = gain * q[:rows, :cols]          # (out, in)
    return w.T                          # stored as (in, out)


def make_params(key):
    ks = jax.random.split(key, 8)
    gain = float(np.sqrt(2.0))          # nn.init.calculate_gain('relu')
    params = {
        "ln0_g": jnp.ones((1, CRITIC_IN), jnp.float32),
        "ln0_b": jnp.zeros((1, CRITIC_IN), jnp.float32),
        "ln1_g": jnp.ones((1, HIDDEN), jnp.float32),
        "ln1_b": jnp.zeros((1, HIDDEN), jnp.float32),
        "ln2a_g": jnp.ones((1, HIDDEN), jnp.float32),
        "ln2a_b": jnp.zeros((1, HIDDEN), jnp.float32),
        "ln2b_g": jnp.ones((1, HIDDEN), jnp.float32),
        "ln2b_b": jnp.zeros((1, HIDDEN), jnp.float32),
        "w1": _orthogonal(ks[0], HIDDEN, CRITIC_IN, gain),
        "b1": jnp.zeros((1, HIDDEN), jnp.float32),
        "w2a": _orthogonal(ks[1], HIDDEN, HIDDEN, gain),
        "b2a": jnp.zeros((1, HIDDEN), jnp.float32),
        "w2b": _orthogonal(ks[2], HIDDEN, HIDDEN, gain),
        "b2b": jnp.zeros((1, HIDDEN), jnp.float32),
        "w_head": jax.random.uniform(
            ks[3], (HIDDEN, OUT_DIM), jnp.float32,
            minval=-1.0 / np.sqrt(HIDDEN), maxval=1.0 / np.sqrt(HIDDEN)),
        # TODO(synk): CARE_ENCODER's definition is not in the reference source;
        # stand-in = ReLU(Linear(state)) concat learned task embedding.
        "care_w": _orthogonal(ks[4], LOCAL_OBS_DIM, LOCAL_OBS_DIM, gain),
        "care_b": jnp.zeros((1, LOCAL_OBS_DIM), jnp.float32),
        "task_emb": jax.random.normal(ks[5], (N_TASKS, TASK_EMB_DIM), jnp.float32),
    }
    return params


# --------------------------- pure-JAX reference -------------------------------
def _ref_forward(states, policy_actions, params, task_id):
    p = params
    s2 = states.reshape(-1, LOCAL_OBS_DIM)
    a2 = policy_actions.reshape(-1, ACTION_DIM)
    enc = jnp.maximum(s2 @ p["care_w"] + p["care_b"], 0.0)
    temb = jnp.broadcast_to(p["task_emb"][task_id], (enc.shape[0], TASK_EMB_DIM))
    x = jnp.concatenate([enc, temb, a2], axis=-1)

    def ln(h, g, b):
        mu = h.mean(-1, keepdims=True)
        var = ((h - mu) ** 2).mean(-1, keepdims=True)
        return (h - mu) / jnp.sqrt(var + LN_EPS) * g + b

    h = ln(x, p["ln0_g"], p["ln0_b"])
    h = ln(jnp.maximum(h @ p["w1"] + p["b1"], 0.0), p["ln1_g"], p["ln1_b"])
    h = ln(jnp.maximum(h @ p["w2a"] + p["b2a"], 0.0), p["ln2a_g"], p["ln2a_b"])
    h = ln(jnp.maximum(h @ p["w2b"] + p["b2b"], 0.0), p["ln2b_g"], p["ln2b_b"])
    return (h @ p["w_head"]).reshape(-1, 1, OUT_DIM)


if __name__ == "__main__":
    key = jax.random.PRNGKey(0)
    k_params, k_s, k_a, k_g = jax.random.split(key, 4)
    params = make_params(k_params)

    # perturb LN affine params away from (1, 0) so the gamma/beta-folding path is
    # genuinely exercised by the numerics check (module semantics hold for any params)
    gk = jax.random.split(k_g, 8)
    for i, name in enumerate(["ln0", "ln1", "ln2a", "ln2b"]):
        params[name + "_g"] = params[name + "_g"] + \
            0.1 * jax.random.normal(gk[2 * i], params[name + "_g"].shape)
        params[name + "_b"] = params[name + "_b"] + \
            0.1 * jax.random.normal(gk[2 * i + 1], params[name + "_b"].shape)

    # bf16 matmul operands (f32 accumulation/LN) -> looser tolerance than f32-only
    TOL = 4e-2

    B, T = 2, 4
    states = jax.random.normal(k_s, (B, T, LOCAL_OBS_DIM), jnp.float32)
    policy_actions = jax.random.normal(k_a, (B, T, ACTION_DIM), jnp.float32)

    logits = jax.block_until_ready(gpt_mlp_forward(states, policy_actions, params, task_id=1))
    assert logits.shape == (B * T, 1, OUT_DIM)
    ref = _ref_forward(states, policy_actions, params, 1)
    np.testing.assert_allclose(np.asarray(logits), np.asarray(ref), rtol=TOL, atol=TOL)

    # second check: multi-step (even) grid with a ragged last block (tiled path)
    N2 = 300
    k1, k2 = jax.random.split(jax.random.PRNGKey(1))
    s2 = jax.random.normal(k1, (N2, LOCAL_OBS_DIM), jnp.float32)
    a2 = jax.random.normal(k2, (N2, ACTION_DIM), jnp.float32)
    y2 = jax.block_until_ready(gpt_mlp_pallas(s2, a2, params, task_id=0, tm_max=128))
    ref2 = _ref_forward(s2, a2, params, 0).reshape(N2, OUT_DIM)
    np.testing.assert_allclose(np.asarray(y2), np.asarray(ref2), rtol=TOL, atol=TOL)

    print("KERNEL_OK")
</pallas_src>

<mosaic_0001>
module attributes {stable_mosaic.version = 11 : i64} {
  func.func @gpt_mlp_kernel(%arg0: i32, %arg1: memref<8x24xf32, #tpu.memory_space<vmem>>, %arg2: memref<8x8xf32, #tpu.memory_space<vmem>>, %arg3: memref<304x64xbf16, #tpu.memory_space<vmem>>, %arg4: memref<16x64xf32, #tpu.memory_space<vmem>>, %arg5: memref<8x8xf32, #tpu.memory_space<vmem>>) attributes {dimension_semantics = [#tpu.dimension_semantics<parallel>], iteration_bounds = array<i64: 1>, scalar_prefetch = 0 : i64, scratch_operands = 0 : i64, tpu.core_type = #tpu.core_type<tc>, window_params = [{transform_indices = @transform_0, window_bounds = array<i64: 8, 24>}, {transform_indices = @transform_1, window_bounds = array<i64: 8, 8>}, {pipeline_mode = #tpu.pipeline_mode<synchronous>, transform_indices = @transform_2, window_bounds = array<i64: 304, 64>}, {pipeline_mode = #tpu.pipeline_mode<synchronous>, transform_indices = @transform_3, window_bounds = array<i64: 16, 64>}, {transform_indices = @transform_4, window_bounds = array<i64: 8, 8>}]} {
    %c0 = arith.constant 0 : index
    %c0_0 = arith.constant 0 : index
    %0 = vector.load %arg3[%c0, %c0_0] : memref<304x64xbf16, #tpu.memory_space<vmem>>, vector<64x64xbf16>
    %c64 = arith.constant 64 : index
    %c0_1 = arith.constant 0 : index
    %1 = vector.load %arg3[%c64, %c0_1] : memref<304x64xbf16, #tpu.memory_space<vmem>>, vector<64x64xbf16>
    %c128 = arith.constant 128 : index
    %c0_2 = arith.constant 0 : index
    %2 = vector.load %arg3[%c128, %c0_2] : memref<304x64xbf16, #tpu.memory_space<vmem>>, vector<64x64xbf16>
    %c192 = arith.constant 192 : index
    %c0_3 = arith.constant 0 : index
    %3 = vector.load %arg3[%c192, %c0_3] : memref<304x64xbf16, #tpu.memory_space<vmem>>, vector<64x64xbf16>
    %c256 = arith.constant 256 : index
    %c0_4 = arith.constant 0 : index
    %4 = vector.load %arg3[%c256, %c0_4] : memref<304x64xbf16, #tpu.memory_space<vmem>>, vector<8x64xbf16>
    %c272 = arith.constant 272 : index
    %c0_5 = arith.constant 0 : index
    %5 = vector.load %arg3[%c272, %c0_5] : memref<304x64xbf16, #tpu.memory_space<vmem>>, vector<24x64xbf16>
    %c0_6 = arith.constant 0 : index
    %c0_7 = arith.constant 0 : index
    %6 = vector.load %arg4[%c0_6, %c0_7] : memref<16x64xf32, #tpu.memory_space<vmem>>, vector<1x64xf32>
    %c1 = arith.constant 1 : index
    %c0_8 = arith.constant 0 : index
    %7 = vector.load %arg4[%c1, %c0_8] : memref<16x64xf32, #tpu.memory_space<vmem>>, vector<1x64xf32>
    %c2 = arith.constant 2 : index
    %c0_9 = arith.constant 0 : index
    %8 = vector.load %arg4[%c2, %c0_9] : memref<16x64xf32, #tpu.memory_space<vmem>>, vector<1x64xf32>
    %c3 = arith.constant 3 : index
    %c0_10 = arith.constant 0 : index
    %9 = vector.load %arg4[%c3, %c0_10] : memref<16x64xf32, #tpu.memory_space<vmem>>, vector<1x8xf32>
    %c4 = arith.constant 4 : index
    %c0_11 = arith.constant 0 : index
    %10 = vector.load %arg4[%c4, %c0_11] : memref<16x64xf32, #tpu.memory_space<vmem>>, vector<1x64xf32>
    %c5 = arith.constant 5 : index
    %c0_12 = arith.constant 0 : index
    %11 = vector.load %arg4[%c5, %c0_12] : memref<16x64xf32, #tpu.memory_space<vmem>>, vector<1x64xf32>
    %c6 = arith.constant 6 : index
    %c0_13 = arith.constant 0 : index
    %12 = vector.load %arg4[%c6, %c0_13] : memref<16x64xf32, #tpu.memory_space<vmem>>, vector<1x64xf32>
    %c7 = arith.constant 7 : index
    %c0_14 = arith.constant 0 : index
    %13 = vector.load %arg4[%c7, %c0_14] : memref<16x64xf32, #tpu.memory_space<vmem>>, vector<1x1xf32>
    %c8 = arith.constant 8 : index
    %c0_15 = arith.constant 0 : index
    %14 = vector.load %arg4[%c8, %c0_15] : memref<16x64xf32, #tpu.memory_space<vmem>>, vector<1x1xf32>
    %c0_16 = arith.constant 0 : index
    %c0_17 = arith.constant 0 : index
    %15 = vector.load %arg1[%c0_16, %c0_17] : memref<8x24xf32, #tpu.memory_space<vmem>>, vector<8x24xf32>
    %c0_18 = arith.constant 0 : index
    %c0_19 = arith.constant 0 : index
    %16 = vector.load %arg2[%c0_18, %c0_19] : memref<8x8xf32, #tpu.memory_space<vmem>>, vector<8x8xf32>
    %17 = arith.truncf %15 : vector<8x24xf32> to vector<8x24xbf16>
    %cst = arith.constant dense<0.000000e+00> : vector<8x64xf32>
    %18 = tpu.matmul %17, %5, %cst {dimension_numbers = #tpu.dot_dimension_numbers<[1], [0], [0], [1], [0, 0, 1, 1], [], []>} : vector<8x24xbf16>, vector<24x64xbf16>, vector<8x64xf32> -> vector<8x64xf32>
    %19 = vector.broadcast %10 : vector<1x64xf32> to vector<8x64xf32>
    %20 = arith.addf %18, %19 : vector<8x64xf32>
    %cst_20 = arith.constant 0.000000e+00 : f32
    %21 = vector.broadcast %cst_20 : f32 to vector<8x64xf32>
    %22 = arith.maximumf %20, %21 : vector<8x64xf32>
    %cst_21 = arith.constant dense<0.000000e+00> : vector<8xf32>
    %23 = vector.multi_reduction <add>, %22, %cst_21 [1] : vector<8x64xf32> to vector<8xf32>
    %24 = vector.shape_cast %23 : vector<8xf32> to vector<8x1xf32>
    %cst_22 = arith.constant dense<0.000000e+00> : vector<8xf32>
    %25 = vector.multi_reduction <add>, %16, %cst_22 [1] : vector<8x8xf32> to vector<8xf32>
    %26 = vector.shape_cast %25 : vector<8xf32> to vector<8x1xf32>
    %27 = arith.addf %24, %26 : vector<8x1xf32>
    %28 = vector.broadcast %13 : vector<1x1xf32> to vector<8x1xf32>
    %29 = arith.addf %27, %28 : vector<8x1xf32>
    %30 = arith.mulf %22, %22 : vector<8x64xf32>
    %cst_23 = arith.constant dense<0.000000e+00> : vector<8xf32>
    %31 = vector.multi_reduction <add>, %30, %cst_23 [1] : vector<8x64xf32> to vector<8xf32>
    %32 = vector.shape_cast %31 : vector<8xf32> to vector<8x1xf32>
    %33 = arith.mulf %16, %16 : vector<8x8xf32>
    %cst_24 = arith.constant dense<0.000000e+00> : vector<8xf32>
    %34 = vector.multi_reduction <add>, %33, %cst_24 [1] : vector<8x8xf32> to vector<8xf32>
    %35 = vector.shape_cast %34 : vector<8xf32> to vector<8x1xf32>
    %36 = arith.addf %32, %35 : vector<8x1xf32>
    %37 = vector.broadcast %14 : vector<1x1xf32> to vector<8x1xf32>
    %38 = arith.addf %36, %37 : vector<8x1xf32>
    %cst_25 = arith.constant 0.027777778 : f32
    %39 = vector.broadcast %cst_25 : f32 to vector<8x1xf32>
    %40 = arith.mulf %29, %39 : vector<8x1xf32>
    %cst_26 = arith.constant 0.027777778 : f32
    %41 = vector.broadcast %cst_26 : f32 to vector<8x1xf32>
    %42 = arith.mulf %38, %41 : vector<8x1xf32>
    %43 = arith.mulf %40, %40 : vector<8x1xf32>
    %44 = arith.subf %42, %43 : vector<8x1xf32>
    %cst_27 = arith.constant 9.99999974E-6 : f32
    %45 = vector.broadcast %cst_27 : f32 to vector<8x1xf32>
    %46 = arith.addf %44, %45 : vector<8x1xf32>
    %47 = math.rsqrt %46 : vector<8x1xf32>
    %48 = arith.truncf %22 : vector<8x64xf32> to vector<8x64xbf16>
    %cst_28 = arith.constant dense<0.000000e+00> : vector<8x64xf32>
    %49 = tpu.matmul %48, %0, %cst_28 {dimension_numbers = #tpu.dot_dimension_numbers<[1], [0], [0], [1], [0, 0, 1, 1], [], []>} : vector<8x64xbf16>, vector<64x64xbf16>, vector<8x64xf32> -> vector<8x64xf32>
    %50 = arith.truncf %16 : vector<8x8xf32> to vector<8x8xbf16>
    %cst_29 = arith.constant dense<0.000000e+00> : vector<8x64xf32>
    %51 = tpu.matmul %50, %4, %cst_29 {dimension_numbers = #tpu.dot_dimension_numbers<[1], [0], [0], [1], [0, 0, 1, 1], [], []>} : vector<8x8xbf16>, vector<8x64xbf16>, vector<8x64xf32> -> vector<8x64xf32>
    %52 = arith.addf %49, %51 : vector<8x64xf32>
    %53 = vector.broadcast %11 : vector<1x64xf32> to vector<8x64xf32>
    %54 = arith.addf %52, %53 : vector<8x64xf32>
    %55 = vector.broadcast %47 : vector<8x1xf32> to vector<8x64xf32>
    %56 = arith.mulf %55, %54 : vector<8x64xf32>
    %57 = arith.mulf %40, %47 : vector<8x1xf32>
    %58 = vector.broadcast %57 : vector<8x1xf32> to vector<8x64xf32>
    %59 = vector.broadcast %12 : vector<1x64xf32> to vector<8x64xf32>
    %60 = arith.mulf %58, %59 : vector<8x64xf32>
    %61 = arith.subf %56, %60 : vector<8x64xf32>
    %62 = vector.broadcast %6 : vector<1x64xf32> to vector<8x64xf32>
    %63 = arith.addf %61, %62 : vector<8x64xf32>
    %cst_30 = arith.constant 0.000000e+00 : f32
    %64 = vector.broadcast %cst_30 : f32 to vector<8x64xf32>
    %65 = arith.maximumf %63, %64 : vector<8x64xf32>
    %cst_31 = arith.constant dense<0.000000e+00> : vector<8xf32>
    %66 = vector.multi_reduction <add>, %65, %cst_31 [1] : vector<8x64xf32> to vector<8xf32>
    %67 = vector.shape_cast %66 : vector<8xf32> to vector<8x1xf32>
    %68 = arith.mulf %65, %65 : vector<8x64xf32>
    %cst_32 = arith.constant dense<0.000000e+00> : vector<8xf32>
    %69 = vector.multi_reduction <add>, %68, %cst_32 [1] : vector<8x64xf32> to vector<8xf32>
    %70 = vector.shape_cast %69 : vector<8xf32> to vector<8x1xf32>
    %cst_33 = arith.constant 1.562500e-02 : f32
    %71 = vector.broadcast %cst_33 : f32 to vector<8x1xf32>
    %72 = arith.mulf %67, %71 : vector<8x1xf32>
    %cst_34 = arith.constant 1.562500e-02 : f32
    %73 = vector.broadcast %cst_34 : f32 to vector<8x1xf32>
    %74 = arith.mulf %70, %73 : vector<8x1xf32>
    %75 = arith.mulf %72, %72 : vector<8x1xf32>
    %76 = arith.subf %74, %75 : vector<8x1xf32>
    %77 = vector.broadcast %72 : vector<8x1xf32> to vector<8x64xf32>
    %78 = arith.subf %65, %77 : vector<8x64xf32>
    %cst_35 = arith.constant 9.99999974E-6 : f32
    %79 = vector.broadcast %cst_35 : f32 to vector<8x1xf32>
    %80 = arith.addf %76, %79 : vector<8x1xf32>
    %81 = math.rsqrt %80 : vector<8x1xf32>
    %82 = vector.broadcast %81 : vector<8x1xf32> to vector<8x64xf32>
    %83 = arith.mulf %78, %82 : vector<8x64xf32>
    %84 = arith.truncf %83 : vector<8x64xf32> to vector<8x64xbf16>
    %cst_36 = arith.constant dense<0.000000e+00> : vector<8x64xf32>
    %85 = tpu.matmul %84, %1, %cst_36 {dimension_numbers = #tpu.dot_dimension_numbers<[1], [0], [0], [1], [0, 0, 1, 1], [], []>} : vector<8x64xbf16>, vector<64x64xbf16>, vector<8x64xf32> -> vector<8x64xf32>
    %86 = vector.broadcast %7 : vector<1x64xf32> to vector<8x64xf32>
    %87 = arith.addf %85, %86 : vector<8x64xf32>
    %cst_37 = arith.constant 0.000000e+00 : f32
    %88 = vector.broadcast %cst_37 : f32 to vector<8x64xf32>
    %89 = arith.maximumf %87, %88 : vector<8x64xf32>
    %cst_38 = arith.constant dense<0.000000e+00> : vector<8xf32>
    %90 = vector.multi_reduction <add>, %89, %cst_38 [1] : vector<8x64xf32> to vector<8xf32>
    %91 = vector.shape_cast %90 : vector<8xf32> to vector<8x1xf32>
    %92 = arith.mulf %89, %89 : vector<8x64xf32>
    %cst_39 = arith.constant dense<0.000000e+00> : vector<8xf32>
    %93 = vector.multi_reduction <add>, %92, %cst_39 [1] : vector<8x64xf32> to vector<8xf32>
    %94 = vector.shape_cast %93 : vector<8xf32> to vector<8x1xf32>
    %cst_40 = arith.constant 1.562500e-02 : f32
    %95 = vector.broadcast %cst_40 : f32 to vector<8x1xf32>
    %96 = arith.mulf %91, %95 : vector<8x1xf32>
    %cst_41 = arith.constant 1.562500e-02 : f32
    %97 = vector.broadcast %cst_41 : f32 to vector<8x1xf32>
    %98 = arith.mulf %94, %97 : vector<8x1xf32>
    %99 = arith.mulf %96, %96 : vector<8x1xf32>
    %100 = arith.subf %98, %99 : vector<8x1xf32>
    %101 = vector.broadcast %96 : vector<8x1xf32> to vector<8x64xf32>
    %102 = arith.subf %89, %101 : vector<8x64xf32>
    %cst_42 = arith.constant 9.99999974E-6 : f32
    %103 = vector.broadcast %cst_42 : f32 to vector<8x1xf32>
    %104 = arith.addf %100, %103 : vector<8x1xf32>
    %105 = math.rsqrt %104 : vector<8x1xf32>
    %106 = vector.broadcast %105 : vector<8x1xf32> to vector<8x64xf32>
    %107 = arith.mulf %102, %106 : vector<8x64xf32>
    %108 = arith.truncf %107 : vector<8x64xf32> to vector<8x64xbf16>
    %cst_43 = arith.constant dense<0.000000e+00> : vector<8x64xf32>
    %109 = tpu.matmul %108, %2, %cst_43 {dimension_numbers = #tpu.dot_dimension_numbers<[1], [0], [0], [1], [0, 0, 1, 1], [], []>} : vector<8x64xbf16>, vector<64x64xbf16>, vector<8x64xf32> -> vector<8x64xf32>
    %110 = vector.broadcast %8 : vector<1x64xf32> to vector<8x64xf32>
    %111 = arith.addf %109, %110 : vector<8x64xf32>
    %cst_44 = arith.constant 0.000000e+00 : f32
    %112 = vector.broadcast %cst_44 : f32 to vector<8x64xf32>
    %113 = arith.maximumf %111, %112 : vector<8x64xf32>
    %cst_45 = arith.constant dense<0.000000e+00> : vector<8xf32>
    %114 = vector.multi_reduction <add>, %113, %cst_45 [1] : vector<8x64xf32> to vector<8xf32>
    %115 = vector.shape_cast %114 : vector<8xf32> to vector<8x1xf32>
    %116 = arith.mulf %113, %113 : vector<8x64xf32>
    %cst_46 = arith.constant dense<0.000000e+00> : vector<8xf32>
    %117 = vector.multi_reduction <add>, %116, %cst_46 [1] : vector<8x64xf32> to vector<8xf32>
    %118 = vector.shape_cast %117 : vector<8xf32> to vector<8x1xf32>
    %cst_47 = arith.constant 1.562500e-02 : f32
    %119 = vector.broadcast %cst_47 : f32 to vector<8x1xf32>
    %120 = arith.mulf %115, %119 : vector<8x1xf32>
    %cst_48 = arith.constant 1.562500e-02 : f32
    %121 = vector.broadcast %cst_48 : f32 to vector<8x1xf32>
    %122 = arith.mulf %118, %121 : vector<8x1xf32>
    %123 = arith.mulf %120, %120 : vector<8x1xf32>
    %124 = arith.subf %122, %123 : vector<8x1xf32>
    %125 = vector.broadcast %120 : vector<8x1xf32> to vector<8x64xf32>
    %126 = arith.subf %113, %125 : vector<8x64xf32>
    %cst_49 = arith.constant 9.99999974E-6 : f32
    %127 = vector.broadcast %cst_49 : f32 to vector<8x1xf32>
    %128 = arith.addf %124, %127 : vector<8x1xf32>
    %129 = math.rsqrt %128 : vector<8x1xf32>
    %130 = vector.broadcast %129 : vector<8x1xf32> to vector<8x64xf32>
    %131 = arith.mulf %126, %130 : vector<8x64xf32>
    %132 = arith.truncf %131 : vector<8x64xf32> to vector<8x64xbf16>
    %cst_50 = arith.constant dense<0.000000e+00> : vector<8x64xf32>
    %133 = tpu.matmul %132, %3, %cst_50 {dimension_numbers = #tpu.dot_dimension_numbers<[1], [0], [0], [1], [0, 0, 1, 1], [], []>} : vector<8x64xbf16>, vector<64x64xbf16>, vector<8x64xf32> -> vector<8x64xf32>
    %134 = vector.extract_strided_slice %133 {offsets = [0, 0], sizes = [8, 8], strides = [1, 1]} : vector<8x64xf32> to vector<8x8xf32>
    %135 = vector.broadcast %9 : vector<1x8xf32> to vector<8x8xf32>
    %136 = arith.addf %134, %135 : vector<8x8xf32>
    %c0_51 = arith.constant 0 : index
    %c0_52 = arith.constant 0 : index
    %137 = vector.load %arg5[%c0_51, %c0_52] : memref<8x8xf32, #tpu.memory_space<vmem>>, vector<8x8xf32>
    tpu.vector_store %arg5[%c0_51, %c0_52], %136 {strides = array<i32>} : memref<8x8xf32, #tpu.memory_space<vmem>>, vector<8x8xf32>,
    return
  }
  func.func @transform_0(%arg0: i32) -> (i32, i32) {
    %c0_i32 = arith.constant 0 : i32
    %c0_i32_0 = arith.constant 0 : i32
    return %arg0, %c0_i32 : i32, i32
  }
  func.func @transform_1(%arg0: i32) -> (i32, i32) {
    %c0_i32 = arith.constant 0 : i32
    %c0_i32_0 = arith.constant 0 : i32
    return %arg0, %c0_i32 : i32, i32
  }
  func.func @transform_2(%arg0: i32) -> (i32, i32) {
    %c0_i32 = arith.constant 0 : i32
    %c0_i32_0 = arith.constant 0 : i32
    %c0_i32_1 = arith.constant 0 : i32
    return %c0_i32, %c0_i32_0 : i32, i32
  }
  func.func @transform_3(%arg0: i32) -> (i32, i32) {
    %c0_i32 = arith.constant 0 : i32
    %c0_i32_0 = arith.constant 0 : i32
    %c0_i32_1 = arith.constant 0 : i32
    return %c0_i32, %c0_i32_0 : i32, i32
  }
  func.func @transform_4(%arg0: i32) -> (i32, i32) {
    %c0_i32 = arith.constant 0 : i32
    %c0_i32_0 = arith.constant 0 : i32
    return %arg0, %c0_i32 : i32, i32
  }
}

</mosaic_0001>

<bundles_post_ra>
// kernel: tpu_custom_call.1
= control target key start
LH: loop header
LB: loop body
LE: loop exit
PB: predicated region body
PF: predicated region fallthrough
CT: control target
= control target key end

     0   :  { %v762_v1 = vmov 0.0   ;;  %vm84_vm0 = vcmask 1043456   ;;  %vm763_vm1 = vmmov 0   ;;  %vm133_vm2 = vcmask 64512   ;;  %s940_s0 = inlined_call_operand.vmem [shape: f32[8,24], index: 0, kind: input, shape index: {}]   ;;  %s941_s1 = inlined_call_operand.vmem [shape: f32[8,8], index: 1, kind: input, shape index: {}]   ;;  %s942_s2 = inlined_call_operand.vmem [shape: bf16[304,64], index: 2, kind: input, shape index: {}]   ;;  %s943_s3 = inlined_call_operand.vmem [shape: f32[16,64], index: 3, kind: input, shape index: {}]   ;;  %s944_s4 = inlined_call_operand.hbm [shape: f32[8,8], index: 4, kind: output, shape index: {}]  }
   0x1   :  { %v712_v0 = vld [vmem:[%s942_s2 + $0x88] sm:$0xff]   ;;  %644 = vmatprep.subr.bf16.mxu0 %v762_v1  ;;  %v713_v2 = vld [vmem:[%s942_s2 + $0x90] ss:$0 sps:$4 sm:$0xff]   ;;  %652 = vmatprep.subr.bf16.mxu1 %v762_v1  ;;  %v64_v3 = vld [vmem:[%s940_s0] sm:$0xff]  ;;  %vm80_vm3 = vcmask 195584  }
   0x2   :  { %645 = vmatpush3.bf16.msra.mxu0 %v712_v0  ;;  %648 = vmatprep.mubr.msk.bf16.mxu0 %vm763_vm1, %v762_v1  ;;  %v51_v4 = vld [vmem:[%s942_s2 + $0x80] sm:$0xf]  ;;  %v86_v6 = vsel %vm84_vm0, %v713_v2, 0  ;;  %v66_v10 = vpack.c.bf16 %v64_v3, %v64_v3  ;;  %v715_v11 = vld [vmem:[%s942_s2 + $0x8] sm:$0xff]  }
   0x3   :  { %v65_v5 = vld [vmem:[%s941_s1] sm:$0xff]  ;;  %646 = vmatprep.subr.bf16.mxu0 %v762_v1  ;;  %v169_v7 = vsel %vm84_vm0, %v51_v4, 0  ;;  %654 = vmatprep.mubr.msk.bf16.mxu1 %vm763_vm1, %v762_v1 }
   0x4   :  { %v164_v8 = vpack.c.bf16 %v65_v5, %v65_v5  ;;  %653 = vmatpush3.bf16.msra.mxu1 %v169_v7  ;;  %v714_v9 = vld [vmem:[%s942_s2] sm:$0xff]  }
   0x5   :  { %658 = vmatprep.subr.bf16.mxu1 %v762_v1 }
   0x6   :  { %647 = vmatpush3.bf16.msra.mxu0 %v86_v6 }
   0x7   :  { %655 = vmatmul.mubr.msk.bf16.vlgmr.msra.gmra.mrb[0].mxu1 %vm133_vm2, %v164_v8  ;;  %670 = vmatprep.subr.bf16.mxu0 %v762_v1 }
   0x8   :  { %659 = vmatpush3.bf16.msra.mxu1 %v714_v9  ;;  %666 = vmatprep.mubr.msk.bf16.mxu1 %vm763_vm1, %v762_v1 }
   0x9   :  { %649 = vmatmul.mubr.msk.bf16.vlgmr.msra.gmra.mrb[0].mxu0 %vm80_vm3, %v66_v10  ;;  %660 = vmatprep.subr.bf16.mxu1 %v762_v1 }
   0xa   :  { %678 = vmatprep.mubr.msk.bf16.mxu0 %vm763_vm1, %v762_v1 }
   0xc   :  { %661 = vmatpush3.bf16.msra.mxu1 %v715_v11 }
   0xd   :  { %662 = vmatprep.subr.bf16.mxu1 %v762_v1 }
   0xe   :  { %9 = vsyncpa [#allocation3], 0  ;;  %v716_v12 = vld [vmem:[%s942_s2 + $0x10] sm:$0xff]   ;;  %v717_v13 = vld [vmem:[%s942_s2 + $0x18] sm:$0xff]   ;;  %vm129_vm4 = vcmask 523264   ;;  %v147_v24 = vmul.f32 %v65_v5, %v65_v5  ;;  %v134_v26 = vsel %vm133_vm2, %v65_v5, 0.0 }
   0xf   :  { %v586_v14 = vld [vmem:[%s943_s3 + $0x4] ss:$0 sm:$0xff]  ;;  %v764_v28 = vmov 0   ;;  %v590_v35 = vld [vmem:[%s943_s3 + $0x7] ss:$0 sm:$0xff]  ;;  %v719_v7 = vld [vmem:[%s942_s2 + $0x28] sm:$0xff]  }
  0x10   :  { %663 = vmatpush3.bf16.msra.mxu1 %v716_v12  ;;  %v148_v27 = vsel %vm133_vm2, %v147_v24, 0.0  ;;  %710 = vset.pattern.permute.xlu0 %v764_v28  ;;  %v591_v38 = vld [vmem:[%s943_s3 + $0x8] ss:$0 sm:$0xff]  ;;  %v598_v55 = vld [vmem:[%s943_s3 + $0x5] ss:$0 sm:$0xff]  ;;  %v720_v8 = vld [vmem:[%s942_s2 + $0x30] sm:$0xff]  }
  0x11   :  { %664 = vmatprep.subr.bf16.mxu1 %v762_v1  ;;  %711 = vset.pattern.permute.xlu1 %v764_v28  ;;  %v599_v57 = vld [vmem:[%s943_s3 + $0x6] ss:$0 sm:$0xff]  ;;  %v600_v62 = vld [vmem:[%s943_s3] ss:$0 sm:$0xff]  ;;  %v721_v9 = vld [vmem:[%s942_s2 + $0x38] sm:$0xff]  }
  0x12   :  { %v718_v6 = vld [vmem:[%s942_s2 + $0x20] sm:$0xff]  }
  0x13   :  { %671 = vmatpush3.bf16.msra.mxu0 %v718_v6 }
  0x14   :  { %665 = vmatpush3.bf16.msra.mxu1 %v717_v13  ;;  %672 = vmatprep.subr.bf16.mxu0 %v762_v1 }
  0x15   :  { %682 = vmatprep.subr.bf16.mxu1 %v762_v1 }
  0x17   :  { %673 = vmatpush3.bf16.msra.mxu0 %v719_v7 }
  0x18   :  { %674 = vmatprep.subr.bf16.mxu0 %v762_v1 }
  0x1b   :  { %675 = vmatpush3.bf16.msra.mxu0 %v720_v8  ;;  %v618_v8 = vld [vmem:[%s943_s3 + $0x3] ss:$0 sm:$0xff] }
  0x1c   :  { %676 = vmatprep.subr.bf16.mxu0 %v762_v1 }
  0x1f   :  { %677 = vmatpush3.bf16.msra.mxu0 %v721_v9 }
  0x20   :  { %694 = vmatprep.subr.bf16.mxu0 %v762_v1 }
  0xda   :  { %v205_v29 = vpop.f32.mrb[0].mxu1 }
  0xdb   :  { %v656_v30 = vpop.f32.mrb[1].mxu1 }
  0xdc   :  { %v122_v15 = vpop.f32.mrb[0].mxu0  ;;  %v208_v31 = vpop.f32.mrb[2].mxu1 }
  0xdd   :  { %v123_v16 = vadd.f32 %v586_v14, %v122_v15  ;;  %v650_v17 = vpop.f32.mrb[1].mxu0  ;;  %v657_v32 = vpop.f32.mrb[3].mxu1  ;;  %v722_v31 = vld [vmem:[%s942_s2 + $0x40] sm:$0xff]  }
  0xde   :  { %v125_v18 = vpop.f32.mrb[2].mxu0  ;;  %v723_v32 = vld [vmem:[%s942_s2 + $0x48] sm:$0xff]  }
  0xdf   :  { %v128_v19 = vmax.f32 %v123_v16, 0.0  ;;  %v651_v20 = vpop.f32.mrb[3].mxu0 }
  0xe1   :  { %v163_v21 = vpack.c.bf16 %v128_v19, %v128_v19  ;;  %v130_v22 = vsel %vm129_vm4, %v128_v19, 0.0  ;;  %v143_v23 = vmul.f32 %v128_v19, %v128_v19 }
  0xe2   :  { %131 = vadd.xlane.f32.xlu0 %v130_v22 }
  0xe3   :  { %667 = vmatmul.mubr.msk.bf16.vlgmr.msra.gmra.mrb[4].mxu1 %vm129_vm4, %v163_v21  ;;  %v144_v25 = vsel %vm129_vm4, %v143_v23, 0.0  ;;  %v601_v21 = vld [vmem:[%s943_s3 + $0x1] ss:$0 sm:$0xff] }
  0xe4   :  { %145 = vadd.xlane.f32.xlu1 %v144_v25  ;;  %690 = vmatprep.mubr.msk.bf16.mxu1 %vm763_vm1, %v762_v1 }
  0xe5   :  { %683 = vmatpush3.bf16.msra.mxu1 %v722_v31 }
  0xe6   :  { %135 = vadd.xlane.f32.xlu0 %v134_v26  ;;  %684 = vmatprep.subr.bf16.mxu1 %v762_v1 }
  0xe8   :  { %149 = vadd.xlane.f32.xlu1 %v148_v27 }
  0xe9   :  { %685 = vmatpush3.bf16.msra.mxu1 %v723_v32 }
  0xea   :  { %686 = vmatprep.subr.bf16.mxu1 %v762_v1 }
 0x16f   :  { %v132_v33 = vpop.xlane.xlu0 %131 }
 0x171   :  { %v146_v34 = vpop.xlane.xlu1 %145 }
 0x173   :  { %v136_v36 = vpop.xlane.xlu0 %135 }
 0x174   :  { %v137_v37 = vadd.f32 %v136_v36, %v132_v33  ;;  %v724_v33 = vld [vmem:[%s942_s2 + $0x50] sm:$0xff]  }
 0x175   :  { %v150_v39 = vpop.xlane.xlu1 %149  ;;  %687 = vmatpush3.bf16.msra.mxu1 %v724_v33 }
 0x176   :  { %v142_v40 = vadd.f32 %v590_v35, %v137_v37  ;;  %v151_v41 = vadd.f32 %v150_v39, %v146_v34  ;;  %v725_v34 = vld [vmem:[%s942_s2 + $0x58] sm:$0xff]   ;;  %688 = vmatprep.subr.bf16.mxu1 %v762_v1 }
 0x178   :  { %v157_v42 = vmul.f32 0.027777778, %v142_v40  ;;  %v156_v43 = vadd.f32 %v591_v38, %v151_v41 }
 0x179   :  { %689 = vmatpush3.bf16.msra.mxu1 %v725_v34 }
 0x17a   :  { %v159_v44 = vmul.f32 %v157_v42, %v157_v42  ;;  %v158_v45 = vmul.f32 0.027777778, %v156_v43 }
 0x17c   :  { %v160_v46 = vsub.f32 %v158_v45, %v159_v44 }
 0x17e   :  { %v161_v47 = vadd.f32 1e-05, %v160_v46  ;;  %v607_v46 = vld [vmem:[%s943_s3 + $0x2] ss:$0 sm:$0xff] }
 0x180   :  { %730 = vrsqrt.f32 %v161_v47 }
 0x18a   :  { %v731_v48 = vpop.eup %730 }
 0x18b   :  { %285 = vperm.xlu0 %710, %v731_v48   ;;  %v289_v49 = vmul.f32 %v731_v48, %v157_v42 }
 0x18d   :  { %292 = vperm.xlu1 %711, %v289_v49  }
 0x1b6   :  { %v272_v50 = vpop.f32.mrb[4].mxu1 }
 0x1b7   :  { %v273_v51 = vadd.f32 %v272_v50, %v205_v29  ;;  %v668_v52 = vpop.f32.mrb[5].mxu1 }
 0x1b8   :  { %v275_v53 = vpop.f32.mrb[6].mxu1 }
 0x1b9   :  { %v669_v54 = vpop.f32.mrb[7].mxu1  ;;  %v282_v58 = vadd.f32 %v598_v55, %v273_v51 }
 0x20a   :  { %v286_v56 = vpop.permute.xlu0 %285 }
 0x20b   :  { %v288_v60 = vmul.f32 %v286_v56, %v282_v58  ;;  %v726_v56 = vld [vmem:[%s942_s2 + $0x60] sm:$0xff]   ;;  %v728_v58 = vld [vmem:[%s942_s2 + $0x70] sm:$0xff]  }
 0x20c   :  { %v293_v59 = vpop.permute.xlu1 %292 }
 0x20d   :  { %v299_v61 = vmul.f32 %v599_v57, %v293_v59  ;;  %v727_v57 = vld [vmem:[%s942_s2 + $0x68] sm:$0xff]   ;;  %v729_v59 = vld [vmem:[%s942_s2 + $0x78] sm:$0xff]   ;;  %s765_s2 = smov [#allocation2]  }
 0x20e   :  { %s578_s19 = sshll.u32 %s765_s2, 4  ;;  %s579_s19 = int_to_ptr.vmem [resolvable:$true] %s578_s19 }
 0x20f   :  { %v300_v63 = vsub.f32 %v288_v60, %v299_v61  ;;  %s738_s20 = scalar_lea.vmem %s579_s19, 128  ;;  %p743_p1 = scmp.lt.s32.totalorder %s579_s19, %s579_s19 }
 0x210   :  { %p739_p0 = scmp.ne.s32.totalorder %s579_s19, %s738_s20  ;;  %p744_p2 = scmp.lt.s32.totalorder %s738_s20, %s738_s20 }
 0x211   :  { %v305_v0 = vadd.f32 %v600_v62, %v300_v63 }
 0x212   :  { %p745_p3 = por %p744_p2, %p743_p1 }
 0x213   :  { %v306_v2 = vmax.f32 %v305_v0, 0.0 }
 0x214   :  { %p746_p4 = pnand %p745_p3, %p739_p0 }
 0x215   :  { %v307_v3 = vsel %vm129_vm4, %v306_v2, 0.0  ;;  %v310_v4 = vmul.f32 %v306_v2, %v306_v2 }
 0x216   :  { %308 = vadd.xlane.f32.xlu1 %v307_v3 }
 0x217   :  { %v311_v5 = vsel %vm129_vm4, %v310_v4, 0.0 }
 0x218   :  { %312 = vadd.xlane.f32.xlu0 %v311_v5 }
 0x2a3   :  { %v309_v10 = vpop.xlane.xlu1 %308 }
 0x2a4   :  { %v314_v11 = vmul.f32 0.015625, %v309_v10 }
 0x2a5   :  { %v313_v12 = vpop.xlane.xlu0 %312 }
 0x2a6   :  { %v316_v13 = vmul.f32 %v314_v11, %v314_v11  ;;  %v315_v14 = vmul.f32 0.015625, %v313_v12  ;;  %v318_v17 = vsub.f32 %v306_v2, %v314_v11 }
 0x2a8   :  { %v317_v15 = vsub.f32 %v315_v14, %v316_v13 }
 0x2aa   :  { %v319_v16 = vadd.f32 1e-05, %v317_v15 }
 0x2ac   :  { %732 = vrsqrt.f32 %v319_v16 }
 0x2b6   :  { %v733_v18 = vpop.eup %732 }
 0x2b7   :  { %v321_v19 = vmul.f32 %v733_v18, %v318_v17 }
 0x2b9   :  { %v322_v20 = vpack.c.bf16 %v321_v19, %v321_v19 }
 0x2bb   :  { %679 = vmatmul.mubr.msk.bf16.vlgmr.msra.gmra.mrb[4].mxu0 %vm129_vm4, %v322_v20 }
 0x2bc   :  { %702 = vmatprep.mubr.msk.bf16.mxu0 %vm763_vm1, %v762_v1  ;;  %695 = vmatpush3.bf16.msra.mxu0 %v726_v56 }
 0x2bd   :  { %696 = vmatprep.subr.bf16.mxu0 %v762_v1 }
 0x2c0   :  { %697 = vmatpush3.bf16.msra.mxu0 %v727_v57 }
 0x2c1   :  { %698 = vmatprep.subr.bf16.mxu0 %v762_v1 }
 0x2c4   :  { %699 = vmatpush3.bf16.msra.mxu0 %v728_v58 }
 0x2c5   :  { %700 = vmatprep.subr.bf16.mxu0 %v762_v1 }
 0x2c8   :  { %701 = vmatpush3.bf16.msra.mxu0 %v729_v59 }
 0x38e   :  { %v388_v22 = vpop.f32.mrb[4].mxu0 }
 0x38f   :  { %v389_v23 = vadd.f32 %v601_v21, %v388_v22  ;;  %v680_v24 = vpop.f32.mrb[5].mxu0 }
 0x390   :  { %v391_v25 = vpop.f32.mrb[6].mxu0 }
 0x391   :  { %v394_v26 = vmax.f32 %v389_v23, 0.0  ;;  %v681_v27 = vpop.f32.mrb[7].mxu0 }
 0x393   :  { %v395_v28 = vsel %vm129_vm4, %v394_v26, 0.0  ;;  %v398_v29 = vmul.f32 %v394_v26, %v394_v26 }
 0x394   :  { %396 = vadd.xlane.f32.xlu1 %v395_v28 }
 0x395   :  { %v399_v30 = vsel %vm129_vm4, %v398_v29, 0.0 }
 0x398   :  { %400 = vadd.xlane.f32.xlu1 %v399_v30 }
 0x421   :  { %v397_v35 = vpop.xlane.xlu1 %396 }
 0x422   :  { %v402_v36 = vmul.f32 0.015625, %v397_v35 }
 0x424   :  { %v404_v38 = vmul.f32 %v402_v36, %v402_v36  ;;  %v406_v42 = vsub.f32 %v394_v26, %v402_v36 }
 0x425   :  { %v401_v37 = vpop.xlane.xlu1 %400 }
 0x426   :  { %v403_v39 = vmul.f32 0.015625, %v401_v37 }
 0x428   :  { %v405_v40 = vsub.f32 %v403_v39, %v404_v38 }
 0x42a   :  { %v407_v41 = vadd.f32 1e-05, %v405_v40 }
 0x42c   :  { %734 = vrsqrt.f32 %v407_v41 }
 0x436   :  { %v735_v43 = vpop.eup %734 }
 0x437   :  { %v409_v44 = vmul.f32 %v735_v43, %v406_v42 }
 0x439   :  { %v410_v45 = vpack.c.bf16 %v409_v44, %v409_v44 }
 0x43b   :  { %691 = vmatmul.mubr.msk.bf16.vlgmr.msra.gmra.mrb[8].mxu1 %vm129_vm4, %v410_v45 }
 0x50e   :  { %v476_v47 = vpop.f32.mrb[8].mxu1 }
 0x50f   :  { %v477_v48 = vadd.f32 %v607_v46, %v476_v47  ;;  %v692_v49 = vpop.f32.mrb[9].mxu1 }
 0x510   :  { %v479_v50 = vpop.f32.mrb[10].mxu1 }
 0x511   :  { %v482_v51 = vmax.f32 %v477_v48, 0.0  ;;  %v693_v52 = vpop.f32.mrb[11].mxu1 }
 0x513   :  { %v483_v53 = vsel %vm129_vm4, %v482_v51, 0.0  ;;  %v486_v54 = vmul.f32 %v482_v51, %v482_v51 }
 0x514   :  { %484 = vadd.xlane.f32.xlu1 %v483_v53 }
 0x515   :  { %v487_v55 = vsel %vm129_vm4, %v486_v54, 0.0 }
 0x518   :  { %488 = vadd.xlane.f32.xlu1 %v487_v55 }
 0x5a1   :  { %v485_v60 = vpop.xlane.xlu1 %484 }
 0x5a2   :  { %v490_v61 = vmul.f32 0.015625, %v485_v60 }
 0x5a4   :  { %v492_v63 = vmul.f32 %v490_v61, %v490_v61  ;;  %v494_v4 = vsub.f32 %v482_v51, %v490_v61 }
 0x5a5   :  { %v489_v62 = vpop.xlane.xlu1 %488 }
 0x5a6   :  { %v491_v0 = vmul.f32 0.015625, %v489_v62 }
 0x5a8   :  { %v493_v2 = vsub.f32 %v491_v0, %v492_v63 }
 0x5aa   :  { %v495_v3 = vadd.f32 1e-05, %v493_v2 }
 0x5ac   :  { %736 = vrsqrt.f32 %v495_v3 }
 0x5b6   :  { %v737_v5 = vpop.eup %736 }
 0x5b7   :  { %v497_v6 = vmul.f32 %v737_v5, %v494_v4 }
 0x5b9   :  { %v498_v7 = vpack.c.bf16 %v497_v6, %v497_v6 }
 0x5bb   :  { %703 = vmatmul.mubr.msk.bf16.vlgmr.msra.gmra.mrb[8].mxu0 %vm129_vm4, %v498_v7 }
 0x68e   :  { %v560_v1 = vpop.f32.mrb[8].mxu0 }
 0x68f   :  { %v570_v9 = vadd.f32 %v618_v8, %v560_v1  ;;  %v704_v10 = vpop.f32.mrb[9].mxu0 }
 0x690   :  { %v563_v11 = vpop.f32.mrb[10].mxu0 }
 0x691   :  { %571 = vst.msk [vmem:[#allocation2] sm:$0xff] %vm133_vm2, %v570_v9  ;;  %v705_v12 = vpop.f32.mrb[11].mxu0 }
 0x692   :  { %749 = shalt.err (!%p746_p4)
}
 0x693   :  { %s750_s3 = scalar_lea.hbm %s944_s4, 128 }
 0x694   :  { %p751_p5 = scmp.ne.s32.totalorder %s944_s4, %s750_s3  ;;  %p754_p6 = scmp.lt.u32.totalorder %s750_s3, %s944_s4 }
 0x696   :  { %p756_p7 = pnand %p754_p6, %p751_p5 }
 0x698   :  { %759 = shalt.err (!%p756_p7)
}
 0x699   :  { %581 = dma.vmem_to_hbm [thread:$0]  %s579_s19, 128, %s944_s4, [#allocation3]  }
 0x69a   :  { %760 = dma.done.wait [#allocation3], 128  }
 0x69b   :  { %761 = vsyncadd [#allocation3], 4294967168 }
 0x69c   :  { %585 = vsyncpa [#allocation3], 1 }

</bundles_post_ra>
